<compile_context>
chip_gen: v5e
topology: v5e:2x2
jax: 0.10.0
libtpu: 0.0.40
codegen_flags: <defaults>
</compile_context>

<pallas_src>
import math

import jax
import jax.numpy as jnp
from jax import lax
from jax.experimental import pallas as pl
from jax.experimental.pallas import tpu as pltpu

# --- small, deterministic model dimensions -------------------------------
B = 2          # batch
S = 8          # sequence length
H = 32         # hidden size
NH = 4         # attention heads
DH = H // NH   # head dim
F = 4 * H      # FFN intermediate (= 128, lane aligned)
VOCAB = 100
MAX_POS = 64
NTYPES = 2

# packed small-vector slab layout (f32, (32, 128)):
#   rows 0..10  : parameter vectors (padded to 128 lanes)
#   rows 16..31 : (B*S, B*S) additive attention mask in lanes 0..B*S
(ROW_G0, ROW_B0, ROW_BQK, ROW_BOF, ROW_G1, ROW_B1,
 ROW_C1, ROW_C2, ROW_G2, ROW_B2, ROW_BP) = range(11)
VEC_PARAM_ROWS = 16
MASK_ROW0 = 16
VEC_ROWS = 32
VEC_LANES = 128

# weight slab lane offsets: [Wq | Wk | Wvo | Wp]  -> (H, 224) bf16
OFF_Q = 0
OFF_K = H
OFF_VO = 2 * H
OFF_P = 2 * H + NH * H
W_SLAB_LANES = OFF_P + H        # 224


def _layernorm(x, gamma, beta, eps=1e-12):
    mu = jnp.mean(x, axis=-1, keepdims=True)
    var = jnp.mean((x - mu) ** 2, axis=-1, keepdims=True)
    return (x - mu) * lax.rsqrt(var + eps) * gamma + beta


def _gelu(x):
    c = math.sqrt(2.0 / math.pi)
    return 0.5 * x * (1.0 + jnp.tanh(c * (x + 0.044715 * x * x * x)))


def encoder_kernel(emb_ref, vec_ref, wslab_ref, w1_ref, w2_ref,
                   hid_ref, pool_ref):
    x = emb_ref[...]                         # (B*S, H) f32 summed embeddings
    vecs = vec_ref[...]                      # (32, 128) f32 packed vectors+mask
    wslab = wslab_ref[...]                   # (H, 224)  bf16 [Wq|Wk|Wvo|Wp]

    g0 = vecs[ROW_G0:ROW_G0 + 1, 0:H]
    b0 = vecs[ROW_B0:ROW_B0 + 1, 0:H]
    bq = vecs[ROW_BQK:ROW_BQK + 1, 0:H]
    bk = vecs[ROW_BQK:ROW_BQK + 1, H:2 * H]
    bo = vecs[ROW_BOF:ROW_BOF + 1, 0:H]      # = bv @ Wo + bo (folded offline)
    g1 = vecs[ROW_G1:ROW_G1 + 1, 0:H]
    b1 = vecs[ROW_B1:ROW_B1 + 1, 0:H]
    c1 = vecs[ROW_C1:ROW_C1 + 1, 0:F]
    c2 = vecs[ROW_C2:ROW_C2 + 1, 0:H]
    g2 = vecs[ROW_G2:ROW_G2 + 1, 0:H]
    b2 = vecs[ROW_B2:ROW_B2 + 1, 0:H]
    bp = vecs[ROW_BP:ROW_BP + 1, 0:H]
    mask = vecs[MASK_ROW0:MASK_ROW0 + B * S, 0:B * S]   # (B*S, B*S) additive

    # embedding LayerNorm (f32)
    x = _layernorm(x, g0, b0)

    # ---- fused Q | K | V·Wo projection: ONE MXU push --------------------
    proj = jnp.dot(x.astype(jnp.bfloat16), wslab,
                   preferred_element_type=jnp.float32)   # (B*S, 224)
    q = proj[:, OFF_Q:OFF_Q + H] + bq
    k = proj[:, OFF_K:OFF_K + H] + bk
    vproj = proj[:, OFF_VO:OFF_VO + NH * H]              # (B*S, NH*H) = (16,128)

    # ---- batch-fused multi-head self-attention ---------------------------
    scale = 1.0 / math.sqrt(DH)
    acc = jnp.zeros((B * S, H), jnp.float32)
    for h in range(NH):                                   # static unroll (4)
        c0 = h * DH
        qh = q[:, c0:c0 + DH]
        kh = k[:, c0:c0 + DH]
        # qh @ kh.T over all B*S rows; cross-batch pairs killed by the mask.
        s = lax.dot_general(qh, kh, (((1,), (1,)), ((), ())),
                            preferred_element_type=jnp.float32) * scale + mask
        s = s - jnp.max(s, axis=-1, keepdims=True)
        p = jnp.exp(s)
        p = p * pl.reciprocal(jnp.sum(p, axis=-1, keepdims=True), approx=True)
        # Wv·Wo already folded: P_h @ vproj_h lands directly in output space.
        acc = acc + jnp.dot(p, vproj[:, h * H:(h + 1) * H],
                            preferred_element_type=jnp.float32)
    attn_out = acc + bo

    x1 = _layernorm(x + attn_out, g1, b1)

    # ---- feed-forward ----
    hmid = _gelu(jnp.dot(x1.astype(jnp.bfloat16), w1_ref[...],
                         preferred_element_type=jnp.float32) + c1)   # (B*S, F)
    ffn = jnp.dot(hmid.astype(jnp.bfloat16), w2_ref[...],
                  preferred_element_type=jnp.float32) + c2           # (B*S, H)
    out = _layernorm(x1 + ffn, g2, b2)

    hid_ref[...] = out.astype(hid_ref.dtype)

    # ---- pooler: matmul on the full slab, select CLS rows at the store ----
    wp = wslab[:, OFF_P:OFF_P + H]                        # (H, H) bf16
    pooled = jnp.tanh(jnp.dot(out.astype(jnp.bfloat16), wp,
                              preferred_element_type=jnp.float32) + bp)  # (16,H)
    for b in range(B):
        pool_ref[b:b + 1, :] = pooled[b * S:b * S + 1, :].astype(pool_ref.dtype)


def _pad_row(v, width=VEC_LANES):
    v = jnp.reshape(v, (1, -1)).astype(jnp.float32)
    return jnp.pad(v, ((0, 0), (0, width - v.shape[1])))


def prepare_params(params):
    """Parameter-only preprocessing, done once at init (hoisted out of forward)."""
    # offline Wv·Wo fold: Wvo[:, h*H:(h+1)*H] = Wv[:, h*DH:(h+1)*DH] @ Wo[h*DH:(h+1)*DH, :]
    wvo = jnp.concatenate(
        [params["wv"][:, h * DH:(h + 1) * DH] @ params["wo"][h * DH:(h + 1) * DH, :]
         for h in range(NH)], axis=1)                                # (H, NH*H)
    w_slab = jnp.concatenate(
        [params["wq"], params["wk"], wvo, params["wp"]],
        axis=1).astype(jnp.bfloat16)                                 # (H, 224)

    bo_fused = params["bv"] @ params["wo"] + params["bo"]            # bv@Wo + bo
    bqk = jnp.concatenate([params["bq"], params["bk"]], axis=1)      # (1, 2H)
    vec_rows = [params["g0"], params["b0"], bqk, bo_fused,
                params["g1"], params["b1"], params["c1"], params["c2"],
                params["g2"], params["b2"], params["bp"]]
    vec_base = jnp.concatenate([_pad_row(r) for r in vec_rows], axis=0)
    vec_base = jnp.pad(vec_base,
                       ((0, VEC_PARAM_ROWS - vec_base.shape[0]), (0, 0)))

    return dict(
        word_emb=params["word_emb"].astype(jnp.float32),
        pos_emb=params["pos_emb"].astype(jnp.float32),
        type_emb=params["type_emb"].astype(jnp.float32),
        vec_base=vec_base,                                # (16, 128) f32
        w_slab=w_slab,                                    # (32, 224) bf16
        w1=params["w1"].astype(jnp.bfloat16),             # (32, 128)
        w2=params["w2"].astype(jnp.bfloat16),             # (128, 32)
    )


@jax.jit
def text_encoder_forward(prep, input_ids, attention_mask, token_type_ids):
    assert input_ids.shape == (B, S), "demo kernel compiled for (B, S) = (2, 8)"

    # Embedding gathers are data-dependent: done in (jitted) plain JAX glue.
    emb = (prep["word_emb"][input_ids]
           + prep["pos_emb"][jnp.arange(S)][None, :, :]
           + prep["type_emb"][token_type_ids]).astype(jnp.float32)
    emb = emb.reshape(B * S, H)                                      # fold batch

    # Combined (B*S, B*S) additive mask: block-diagonal per batch + key padding.
    key_ok = attention_mask.reshape(-1).astype(jnp.float32)          # (B*S,)
    batch_ids = jnp.repeat(jnp.arange(B), S)                         # (B*S,)
    same = batch_ids[:, None] == batch_ids[None, :]
    mask = jnp.where(same & (key_ok[None, :] > 0.5), 0.0, -1e9)
    mask = mask.astype(jnp.float32)
    mask_rows = jnp.pad(mask, ((0, 0), (0, VEC_LANES - B * S)))      # (16, 128)
    vecs = jnp.concatenate([prep["vec_base"], mask_rows], axis=0)    # (32, 128)

    vmem = pltpu.MemorySpace.VMEM
    hidden, pooled = pl.pallas_call(
        encoder_kernel,
        out_shape=(jax.ShapeDtypeStruct((B * S, H), jnp.float32),
                   jax.ShapeDtypeStruct((B, H), jnp.float32)),
        # grid-less call: whole arrays resident in VMEM, no pipeline machinery.
        in_specs=[pl.BlockSpec(memory_space=vmem)] * 5,
        out_specs=(pl.BlockSpec(memory_space=vmem),
                   pl.BlockSpec(memory_space=vmem)),
        # NOTE: if scaled to real BERT sizes (H=768, F=3072), add a K-tiled
        # grid for the projections/FFN and set vmem_limit_bytes explicitly
        # (v7x has only 64 MiB VMEM, half of v5e/v6e).
    )(emb, vecs, prep["w_slab"], prep["w1"], prep["w2"])

    return {"last_hidden_state": hidden.reshape(B, S, H),
            "pooler_output": pooled}


def init_params(key):
    keys = jax.random.split(key, 10)

    def nrm(k, shape):
        return (0.02 * jax.random.normal(k, shape)).astype(jnp.float32)

    ones = lambda shape: jnp.ones(shape, jnp.float32)
    zeros = lambda shape: jnp.zeros(shape, jnp.float32)
    return dict(
        word_emb=nrm(keys[0], (VOCAB, H)),
        pos_emb=nrm(keys[1], (MAX_POS, H)),
        type_emb=nrm(keys[2], (NTYPES, H)),
        g0=ones((1, H)), b0=zeros((1, H)),
        wq=nrm(keys[3], (H, H)), bq=zeros((1, H)),
        wk=nrm(keys[4], (H, H)), bk=zeros((1, H)),
        wv=nrm(keys[5], (H, H)), bv=zeros((1, H)),
        wo=nrm(keys[6], (H, H)), bo=zeros((1, H)),
        g1=ones((1, H)), b1=zeros((1, H)),
        w1=nrm(keys[7], (H, F)), c1=zeros((1, F)),
        w2=nrm(keys[8], (F, H)), c2=zeros((1, H)),
        g2=ones((1, H)), b2=zeros((1, H)),
        wp=nrm(keys[9], (H, H)), bp=zeros((1, H)),
    )


class TinyBertTextEncoder:
    """Minimal BERT-style text encoder whose hot path runs in a Pallas kernel."""

    def __init__(self, params):
        self.prep = prepare_params(params)        # weight prep hoisted to init
        self.config = dict(hidden_size=H, num_attention_heads=NH,
                           intermediate_size=F, vocab_size=VOCAB,
                           max_position_embeddings=MAX_POS)

    def __call__(self, *, input_ids, attention_mask=None, token_type_ids=None,
                 **unused):
        if attention_mask is None:
            attention_mask = jnp.ones_like(input_ids)
        if token_type_ids is None:
            token_type_ids = jnp.zeros_like(input_ids)
        return text_encoder_forward(self.prep, input_ids, attention_mask,
                                    token_type_ids)


class TextEncoderShell:
    """Mirror of the PyTorch module: forward(**kw) == self.text_encoder(**kw)."""

    def __init__(self, text_encoder):
        self.text_encoder = text_encoder
        self.config = text_encoder.config

    def __call__(self, **kw):
        return self.text_encoder(**kw)


if __name__ == "__main__":
    key = jax.random.PRNGKey(0)
    pkey, ikey = jax.random.split(key)
    params = init_params(pkey)

    input_ids = jax.random.randint(ikey, (B, S), 0, VOCAB, dtype=jnp.int32)
    attention_mask = jnp.ones((B, S), jnp.int32).at[1, S - 2:].set(0)
    token_type_ids = jnp.zeros((B, S), jnp.int32)

    shell = TextEncoderShell(TinyBertTextEncoder(params))
    out = shell(input_ids=input_ids,
                attention_mask=attention_mask,
                token_type_ids=token_type_ids)

    jax.block_until_ready(out["last_hidden_state"])
    jax.block_until_ready(out["pooler_output"])
    assert out["last_hidden_state"].shape == (B, S, H)
    assert out["pooler_output"].shape == (B, H)
    assert bool(jnp.all(jnp.isfinite(out["last_hidden_state"])))
    assert bool(jnp.all(jnp.isfinite(out["pooler_output"])))
    print("KERNEL_OK")
</pallas_src>

<mosaic_0001>
module attributes {stable_mosaic.version = 11 : i64} {
  func.func @encoder_kernel(%arg0: memref<16x32xf32, #tpu.memory_space<vmem>>, %arg1: memref<32x128xf32, #tpu.memory_space<vmem>>, %arg2: memref<32x224xbf16, #tpu.memory_space<vmem>>, %arg3: memref<32x128xbf16, #tpu.memory_space<vmem>>, %arg4: memref<128x32xbf16, #tpu.memory_space<vmem>>, %arg5: memref<16x32xf32, #tpu.memory_space<vmem>>, %arg6: memref<2x32xf32, #tpu.memory_space<vmem>>) attributes {dimension_semantics = [], scalar_prefetch = 0 : i64, scratch_operands = 0 : i64, tpu.core_type = #tpu.core_type<tc>} {
    %c0 = arith.constant 0 : index
    %c0_0 = arith.constant 0 : index
    %0 = vector.load %arg0[%c0, %c0_0] : memref<16x32xf32, #tpu.memory_space<vmem>>, vector<16x32xf32>
    %c0_1 = arith.constant 0 : index
    %c0_2 = arith.constant 0 : index
    %1 = vector.load %arg1[%c0_1, %c0_2] : memref<32x128xf32, #tpu.memory_space<vmem>>, vector<32x128xf32>
    %c0_3 = arith.constant 0 : index
    %c0_4 = arith.constant 0 : index
    %2 = vector.load %arg2[%c0_3, %c0_4] : memref<32x224xbf16, #tpu.memory_space<vmem>>, vector<32x224xbf16>
    %3 = vector.extract_strided_slice %1 {offsets = [0, 0], sizes = [1, 32], strides = [1, 1]} : vector<32x128xf32> to vector<1x32xf32>
    %4 = vector.extract_strided_slice %1 {offsets = [1, 0], sizes = [1, 32], strides = [1, 1]} : vector<32x128xf32> to vector<1x32xf32>
    %5 = vector.extract_strided_slice %1 {offsets = [2, 0], sizes = [1, 32], strides = [1, 1]} : vector<32x128xf32> to vector<1x32xf32>
    %6 = vector.extract_strided_slice %1 {offsets = [2, 32], sizes = [1, 32], strides = [1, 1]} : vector<32x128xf32> to vector<1x32xf32>
    %7 = vector.extract_strided_slice %1 {offsets = [3, 0], sizes = [1, 32], strides = [1, 1]} : vector<32x128xf32> to vector<1x32xf32>
    %8 = vector.extract_strided_slice %1 {offsets = [4, 0], sizes = [1, 32], strides = [1, 1]} : vector<32x128xf32> to vector<1x32xf32>
    %9 = vector.extract_strided_slice %1 {offsets = [5, 0], sizes = [1, 32], strides = [1, 1]} : vector<32x128xf32> to vector<1x32xf32>
    %10 = vector.extract_strided_slice %1 {offsets = [6, 0], sizes = [1, 128], strides = [1, 1]} : vector<32x128xf32> to vector<1x128xf32>
    %11 = vector.extract_strided_slice %1 {offsets = [7, 0], sizes = [1, 32], strides = [1, 1]} : vector<32x128xf32> to vector<1x32xf32>
    %12 = vector.extract_strided_slice %1 {offsets = [8, 0], sizes = [1, 32], strides = [1, 1]} : vector<32x128xf32> to vector<1x32xf32>
    %13 = vector.extract_strided_slice %1 {offsets = [9, 0], sizes = [1, 32], strides = [1, 1]} : vector<32x128xf32> to vector<1x32xf32>
    %14 = vector.extract_strided_slice %1 {offsets = [10, 0], sizes = [1, 32], strides = [1, 1]} : vector<32x128xf32> to vector<1x32xf32>
    %15 = vector.extract_strided_slice %1 {offsets = [16, 0], sizes = [16, 16], strides = [1, 1]} : vector<32x128xf32> to vector<16x16xf32>
    %cst = arith.constant dense<0.000000e+00> : vector<16xf32>
    %16 = vector.multi_reduction <add>, %0, %cst [1] : vector<16x32xf32> to vector<16xf32>
    %17 = vector.shape_cast %16 : vector<16xf32> to vector<16x1xf32>
    %cst_5 = arith.constant 3.200000e+01 : f32
    %18 = vector.broadcast %cst_5 : f32 to vector<16x1xf32>
    %19 = arith.divf %17, %18 : vector<16x1xf32>
    %20 = vector.broadcast %19 : vector<16x1xf32> to vector<16x32xf32>
    %21 = arith.subf %0, %20 : vector<16x32xf32>
    %22 = arith.mulf %21, %21 : vector<16x32xf32>
    %cst_6 = arith.constant dense<0.000000e+00> : vector<16xf32>
    %23 = vector.multi_reduction <add>, %22, %cst_6 [1] : vector<16x32xf32> to vector<16xf32>
    %24 = vector.shape_cast %23 : vector<16xf32> to vector<16x1xf32>
    %cst_7 = arith.constant 3.200000e+01 : f32
    %25 = vector.broadcast %cst_7 : f32 to vector<16x1xf32>
    %26 = arith.divf %24, %25 : vector<16x1xf32>
    %27 = vector.broadcast %19 : vector<16x1xf32> to vector<16x32xf32>
    %28 = arith.subf %0, %27 : vector<16x32xf32>
    %cst_8 = arith.constant 9.99999996E-13 : f32
    %29 = vector.broadcast %cst_8 : f32 to vector<16x1xf32>
    %30 = arith.addf %26, %29 : vector<16x1xf32>
    %31 = math.rsqrt %30 : vector<16x1xf32>
    %32 = vector.broadcast %31 : vector<16x1xf32> to vector<16x32xf32>
    %33 = arith.mulf %28, %32 : vector<16x32xf32>
    %34 = vector.broadcast %3 : vector<1x32xf32> to vector<16x32xf32>
    %35 = arith.mulf %33, %34 : vector<16x32xf32>
    %36 = vector.broadcast %4 : vector<1x32xf32> to vector<16x32xf32>
    %37 = arith.addf %35, %36 : vector<16x32xf32>
    %38 = arith.truncf %37 : vector<16x32xf32> to vector<16x32xbf16>
    %cst_9 = arith.constant dense<0.000000e+00> : vector<16x224xf32>
    %39 = tpu.matmul %38, %2, %cst_9 {dimension_numbers = #tpu.dot_dimension_numbers<[1], [0], [0], [1], [0, 0, 1, 1], [], []>} : vector<16x32xbf16>, vector<32x224xbf16>, vector<16x224xf32> -> vector<16x224xf32>
    %40 = vector.extract_strided_slice %39 {offsets = [0, 0], sizes = [16, 32], strides = [1, 1]} : vector<16x224xf32> to vector<16x32xf32>
    %41 = vector.broadcast %5 : vector<1x32xf32> to vector<16x32xf32>
    %42 = arith.addf %40, %41 : vector<16x32xf32>
    %43 = vector.extract_strided_slice %39 {offsets = [0, 32], sizes = [16, 32], strides = [1, 1]} : vector<16x224xf32> to vector<16x32xf32>
    %44 = vector.broadcast %6 : vector<1x32xf32> to vector<16x32xf32>
    %45 = arith.addf %43, %44 : vector<16x32xf32>
    %46 = vector.extract_strided_slice %39 {offsets = [0, 64], sizes = [16, 128], strides = [1, 1]} : vector<16x224xf32> to vector<16x128xf32>
    %cst_10 = arith.constant 0.000000e+00 : f32
    %47 = vector.broadcast %cst_10 : f32 to vector<16x32xf32>
    %48 = vector.extract_strided_slice %42 {offsets = [0, 0], sizes = [16, 8], strides = [1, 1]} : vector<16x32xf32> to vector<16x8xf32>
    %49 = vector.extract_strided_slice %45 {offsets = [0, 0], sizes = [16, 8], strides = [1, 1]} : vector<16x32xf32> to vector<16x8xf32>
    %cst_11 = arith.constant dense<0.000000e+00> : vector<16x16xf32>
    %50 = tpu.matmul %48, %49, %cst_11 {dimension_numbers = #tpu.dot_dimension_numbers<[1], [1], [0], [0], [0, 0, 1, 0], [], []>} : vector<16x8xf32>, vector<16x8xf32>, vector<16x16xf32> -> vector<16x16xf32>
    %cst_12 = arith.constant 0.353553385 : f32
    %51 = vector.broadcast %cst_12 : f32 to vector<16x16xf32>
    %52 = arith.mulf %50, %51 : vector<16x16xf32>
    %53 = arith.addf %52, %15 : vector<16x16xf32>
    %cst_13 = arith.constant dense<0xFF800000> : vector<16xf32>
    %54 = vector.multi_reduction <maximumf>, %53, %cst_13 [1] : vector<16x16xf32> to vector<16xf32>
    %55 = vector.shape_cast %54 : vector<16xf32> to vector<16x1xf32>
    %56 = vector.broadcast %55 : vector<16x1xf32> to vector<16x16xf32>
    %57 = arith.subf %53, %56 : vector<16x16xf32>
    %58 = math.exp %57 : vector<16x16xf32>
    %cst_14 = arith.constant dense<0.000000e+00> : vector<16xf32>
    %59 = vector.multi_reduction <add>, %58, %cst_14 [1] : vector<16x16xf32> to vector<16xf32>
    %60 = vector.shape_cast %59 : vector<16xf32> to vector<16x1xf32>
    %61 = tpu.reciprocal %60 {approx = true} : vector<16x1xf32> -> vector<16x1xf32>
    %62 = vector.broadcast %61 : vector<16x1xf32> to vector<16x16xf32>
    %63 = arith.mulf %58, %62 : vector<16x16xf32>
    %64 = vector.extract_strided_slice %46 {offsets = [0, 0], sizes = [16, 32], strides = [1, 1]} : vector<16x128xf32> to vector<16x32xf32>
    %cst_15 = arith.constant dense<0.000000e+00> : vector<16x32xf32>
    %65 = tpu.matmul %63, %64, %cst_15 {dimension_numbers = #tpu.dot_dimension_numbers<[1], [0], [0], [1], [0, 0, 1, 1], [], []>} : vector<16x16xf32>, vector<16x32xf32>, vector<16x32xf32> -> vector<16x32xf32>
    %66 = arith.addf %47, %65 : vector<16x32xf32>
    %67 = vector.extract_strided_slice %42 {offsets = [0, 8], sizes = [16, 8], strides = [1, 1]} : vector<16x32xf32> to vector<16x8xf32>
    %68 = vector.extract_strided_slice %45 {offsets = [0, 8], sizes = [16, 8], strides = [1, 1]} : vector<16x32xf32> to vector<16x8xf32>
    %cst_16 = arith.constant dense<0.000000e+00> : vector<16x16xf32>
    %69 = tpu.matmul %67, %68, %cst_16 {dimension_numbers = #tpu.dot_dimension_numbers<[1], [1], [0], [0], [0, 0, 1, 0], [], []>} : vector<16x8xf32>, vector<16x8xf32>, vector<16x16xf32> -> vector<16x16xf32>
    %cst_17 = arith.constant 0.353553385 : f32
    %70 = vector.broadcast %cst_17 : f32 to vector<16x16xf32>
    %71 = arith.mulf %69, %70 : vector<16x16xf32>
    %72 = arith.addf %71, %15 : vector<16x16xf32>
    %cst_18 = arith.constant dense<0xFF800000> : vector<16xf32>
    %73 = vector.multi_reduction <maximumf>, %72, %cst_18 [1] : vector<16x16xf32> to vector<16xf32>
    %74 = vector.shape_cast %73 : vector<16xf32> to vector<16x1xf32>
    %75 = vector.broadcast %74 : vector<16x1xf32> to vector<16x16xf32>
    %76 = arith.subf %72, %75 : vector<16x16xf32>
    %77 = math.exp %76 : vector<16x16xf32>
    %cst_19 = arith.constant dense<0.000000e+00> : vector<16xf32>
    %78 = vector.multi_reduction <add>, %77, %cst_19 [1] : vector<16x16xf32> to vector<16xf32>
    %79 = vector.shape_cast %78 : vector<16xf32> to vector<16x1xf32>
    %80 = tpu.reciprocal %79 {approx = true} : vector<16x1xf32> -> vector<16x1xf32>
    %81 = vector.broadcast %80 : vector<16x1xf32> to vector<16x16xf32>
    %82 = arith.mulf %77, %81 : vector<16x16xf32>
    %83 = vector.extract_strided_slice %46 {offsets = [0, 32], sizes = [16, 32], strides = [1, 1]} : vector<16x128xf32> to vector<16x32xf32>
    %cst_20 = arith.constant dense<0.000000e+00> : vector<16x32xf32>
    %84 = tpu.matmul %82, %83, %cst_20 {dimension_numbers = #tpu.dot_dimension_numbers<[1], [0], [0], [1], [0, 0, 1, 1], [], []>} : vector<16x16xf32>, vector<16x32xf32>, vector<16x32xf32> -> vector<16x32xf32>
    %85 = arith.addf %66, %84 : vector<16x32xf32>
    %86 = vector.extract_strided_slice %42 {offsets = [0, 16], sizes = [16, 8], strides = [1, 1]} : vector<16x32xf32> to vector<16x8xf32>
    %87 = vector.extract_strided_slice %45 {offsets = [0, 16], sizes = [16, 8], strides = [1, 1]} : vector<16x32xf32> to vector<16x8xf32>
    %cst_21 = arith.constant dense<0.000000e+00> : vector<16x16xf32>
    %88 = tpu.matmul %86, %87, %cst_21 {dimension_numbers = #tpu.dot_dimension_numbers<[1], [1], [0], [0], [0, 0, 1, 0], [], []>} : vector<16x8xf32>, vector<16x8xf32>, vector<16x16xf32> -> vector<16x16xf32>
    %cst_22 = arith.constant 0.353553385 : f32
    %89 = vector.broadcast %cst_22 : f32 to vector<16x16xf32>
    %90 = arith.mulf %88, %89 : vector<16x16xf32>
    %91 = arith.addf %90, %15 : vector<16x16xf32>
    %cst_23 = arith.constant dense<0xFF800000> : vector<16xf32>
    %92 = vector.multi_reduction <maximumf>, %91, %cst_23 [1] : vector<16x16xf32> to vector<16xf32>
    %93 = vector.shape_cast %92 : vector<16xf32> to vector<16x1xf32>
    %94 = vector.broadcast %93 : vector<16x1xf32> to vector<16x16xf32>
    %95 = arith.subf %91, %94 : vector<16x16xf32>
    %96 = math.exp %95 : vector<16x16xf32>
    %cst_24 = arith.constant dense<0.000000e+00> : vector<16xf32>
    %97 = vector.multi_reduction <add>, %96, %cst_24 [1] : vector<16x16xf32> to vector<16xf32>
    %98 = vector.shape_cast %97 : vector<16xf32> to vector<16x1xf32>
    %99 = tpu.reciprocal %98 {approx = true} : vector<16x1xf32> -> vector<16x1xf32>
    %100 = vector.broadcast %99 : vector<16x1xf32> to vector<16x16xf32>
    %101 = arith.mulf %96, %100 : vector<16x16xf32>
    %102 = vector.extract_strided_slice %46 {offsets = [0, 64], sizes = [16, 32], strides = [1, 1]} : vector<16x128xf32> to vector<16x32xf32>
    %cst_25 = arith.constant dense<0.000000e+00> : vector<16x32xf32>
    %103 = tpu.matmul %101, %102, %cst_25 {dimension_numbers = #tpu.dot_dimension_numbers<[1], [0], [0], [1], [0, 0, 1, 1], [], []>} : vector<16x16xf32>, vector<16x32xf32>, vector<16x32xf32> -> vector<16x32xf32>
    %104 = arith.addf %85, %103 : vector<16x32xf32>
    %105 = vector.extract_strided_slice %42 {offsets = [0, 24], sizes = [16, 8], strides = [1, 1]} : vector<16x32xf32> to vector<16x8xf32>
    %106 = vector.extract_strided_slice %45 {offsets = [0, 24], sizes = [16, 8], strides = [1, 1]} : vector<16x32xf32> to vector<16x8xf32>
    %cst_26 = arith.constant dense<0.000000e+00> : vector<16x16xf32>
    %107 = tpu.matmul %105, %106, %cst_26 {dimension_numbers = #tpu.dot_dimension_numbers<[1], [1], [0], [0], [0, 0, 1, 0], [], []>} : vector<16x8xf32>, vector<16x8xf32>, vector<16x16xf32> -> vector<16x16xf32>
    %cst_27 = arith.constant 0.353553385 : f32
    %108 = vector.broadcast %cst_27 : f32 to vector<16x16xf32>
    %109 = arith.mulf %107, %108 : vector<16x16xf32>
    %110 = arith.addf %109, %15 : vector<16x16xf32>
    %cst_28 = arith.constant dense<0xFF800000> : vector<16xf32>
    %111 = vector.multi_reduction <maximumf>, %110, %cst_28 [1] : vector<16x16xf32> to vector<16xf32>
    %112 = vector.shape_cast %111 : vector<16xf32> to vector<16x1xf32>
    %113 = vector.broadcast %112 : vector<16x1xf32> to vector<16x16xf32>
    %114 = arith.subf %110, %113 : vector<16x16xf32>
    %115 = math.exp %114 : vector<16x16xf32>
    %cst_29 = arith.constant dense<0.000000e+00> : vector<16xf32>
    %116 = vector.multi_reduction <add>, %115, %cst_29 [1] : vector<16x16xf32> to vector<16xf32>
    %117 = vector.shape_cast %116 : vector<16xf32> to vector<16x1xf32>
    %118 = tpu.reciprocal %117 {approx = true} : vector<16x1xf32> -> vector<16x1xf32>
    %119 = vector.broadcast %118 : vector<16x1xf32> to vector<16x16xf32>
    %120 = arith.mulf %115, %119 : vector<16x16xf32>
    %121 = vector.extract_strided_slice %46 {offsets = [0, 96], sizes = [16, 32], strides = [1, 1]} : vector<16x128xf32> to vector<16x32xf32>
    %cst_30 = arith.constant dense<0.000000e+00> : vector<16x32xf32>
    %122 = tpu.matmul %120, %121, %cst_30 {dimension_numbers = #tpu.dot_dimension_numbers<[1], [0], [0], [1], [0, 0, 1, 1], [], []>} : vector<16x16xf32>, vector<16x32xf32>, vector<16x32xf32> -> vector<16x32xf32>
    %123 = arith.addf %104, %122 : vector<16x32xf32>
    %124 = vector.broadcast %7 : vector<1x32xf32> to vector<16x32xf32>
    %125 = arith.addf %123, %124 : vector<16x32xf32>
    %126 = arith.addf %37, %125 : vector<16x32xf32>
    %cst_31 = arith.constant dense<0.000000e+00> : vector<16xf32>
    %127 = vector.multi_reduction <add>, %126, %cst_31 [1] : vector<16x32xf32> to vector<16xf32>
    %128 = vector.shape_cast %127 : vector<16xf32> to vector<16x1xf32>
    %cst_32 = arith.constant 3.200000e+01 : f32
    %129 = vector.broadcast %cst_32 : f32 to vector<16x1xf32>
    %130 = arith.divf %128, %129 : vector<16x1xf32>
    %131 = vector.broadcast %130 : vector<16x1xf32> to vector<16x32xf32>
    %132 = arith.subf %126, %131 : vector<16x32xf32>
    %133 = arith.mulf %132, %132 : vector<16x32xf32>
    %cst_33 = arith.constant dense<0.000000e+00> : vector<16xf32>
    %134 = vector.multi_reduction <add>, %133, %cst_33 [1] : vector<16x32xf32> to vector<16xf32>
    %135 = vector.shape_cast %134 : vector<16xf32> to vector<16x1xf32>
    %cst_34 = arith.constant 3.200000e+01 : f32
    %136 = vector.broadcast %cst_34 : f32 to vector<16x1xf32>
    %137 = arith.divf %135, %136 : vector<16x1xf32>
    %138 = vector.broadcast %130 : vector<16x1xf32> to vector<16x32xf32>
    %139 = arith.subf %126, %138 : vector<16x32xf32>
    %cst_35 = arith.constant 9.99999996E-13 : f32
    %140 = vector.broadcast %cst_35 : f32 to vector<16x1xf32>
    %141 = arith.addf %137, %140 : vector<16x1xf32>
    %142 = math.rsqrt %141 : vector<16x1xf32>
    %143 = vector.broadcast %142 : vector<16x1xf32> to vector<16x32xf32>
    %144 = arith.mulf %139, %143 : vector<16x32xf32>
    %145 = vector.broadcast %8 : vector<1x32xf32> to vector<16x32xf32>
    %146 = arith.mulf %144, %145 : vector<16x32xf32>
    %147 = vector.broadcast %9 : vector<1x32xf32> to vector<16x32xf32>
    %148 = arith.addf %146, %147 : vector<16x32xf32>
    %149 = arith.truncf %148 : vector<16x32xf32> to vector<16x32xbf16>
    %c0_36 = arith.constant 0 : index
    %c0_37 = arith.constant 0 : index
    %150 = vector.load %arg3[%c0_36, %c0_37] : memref<32x128xbf16, #tpu.memory_space<vmem>>, vector<32x128xbf16>
    %cst_38 = arith.constant dense<0.000000e+00> : vector<16x128xf32>
    %151 = tpu.matmul %149, %150, %cst_38 {dimension_numbers = #tpu.dot_dimension_numbers<[1], [0], [0], [1], [0, 0, 1, 1], [], []>} : vector<16x32xbf16>, vector<32x128xbf16>, vector<16x128xf32> -> vector<16x128xf32>
    %152 = vector.broadcast %10 : vector<1x128xf32> to vector<16x128xf32>
    %153 = arith.addf %151, %152 : vector<16x128xf32>
    %cst_39 = arith.constant 5.000000e-01 : f32
    %154 = vector.broadcast %cst_39 : f32 to vector<16x128xf32>
    %155 = arith.mulf %154, %153 : vector<16x128xf32>
    %cst_40 = arith.constant 4.471500e-02 : f32
    %156 = vector.broadcast %cst_40 : f32 to vector<16x128xf32>
    %157 = arith.mulf %156, %153 : vector<16x128xf32>
    %158 = arith.mulf %157, %153 : vector<16x128xf32>
    %159 = arith.mulf %158, %153 : vector<16x128xf32>
    %160 = arith.addf %153, %159 : vector<16x128xf32>
    %cst_41 = arith.constant 0.797884583 : f32
    %161 = vector.broadcast %cst_41 : f32 to vector<16x128xf32>
    %162 = arith.mulf %161, %160 : vector<16x128xf32>
    %163 = math.tanh %162 : vector<16x128xf32>
    %cst_42 = arith.constant 1.000000e+00 : f32
    %164 = vector.broadcast %cst_42 : f32 to vector<16x128xf32>
    %165 = arith.addf %164, %163 : vector<16x128xf32>
    %166 = arith.mulf %155, %165 : vector<16x128xf32>
    %167 = arith.truncf %166 : vector<16x128xf32> to vector<16x128xbf16>
    %c0_43 = arith.constant 0 : index
    %c0_44 = arith.constant 0 : index
    %168 = vector.load %arg4[%c0_43, %c0_44] : memref<128x32xbf16, #tpu.memory_space<vmem>>, vector<128x32xbf16>
    %cst_45 = arith.constant dense<0.000000e+00> : vector<16x32xf32>
    %169 = tpu.matmul %167, %168, %cst_45 {dimension_numbers = #tpu.dot_dimension_numbers<[1], [0], [0], [1], [0, 0, 1, 1], [], []>} : vector<16x128xbf16>, vector<128x32xbf16>, vector<16x32xf32> -> vector<16x32xf32>
    %170 = vector.broadcast %11 : vector<1x32xf32> to vector<16x32xf32>
    %171 = arith.addf %169, %170 : vector<16x32xf32>
    %172 = arith.addf %148, %171 : vector<16x32xf32>
    %cst_46 = arith.constant dense<0.000000e+00> : vector<16xf32>
    %173 = vector.multi_reduction <add>, %172, %cst_46 [1] : vector<16x32xf32> to vector<16xf32>
    %174 = vector.shape_cast %173 : vector<16xf32> to vector<16x1xf32>
    %cst_47 = arith.constant 3.200000e+01 : f32
    %175 = vector.broadcast %cst_47 : f32 to vector<16x1xf32>
    %176 = arith.divf %174, %175 : vector<16x1xf32>
    %177 = vector.broadcast %176 : vector<16x1xf32> to vector<16x32xf32>
    %178 = arith.subf %172, %177 : vector<16x32xf32>
    %179 = arith.mulf %178, %178 : vector<16x32xf32>
    %cst_48 = arith.constant dense<0.000000e+00> : vector<16xf32>
    %180 = vector.multi_reduction <add>, %179, %cst_48 [1] : vector<16x32xf32> to vector<16xf32>
    %181 = vector.shape_cast %180 : vector<16xf32> to vector<16x1xf32>
    %cst_49 = arith.constant 3.200000e+01 : f32
    %182 = vector.broadcast %cst_49 : f32 to vector<16x1xf32>
    %183 = arith.divf %181, %182 : vector<16x1xf32>
    %184 = vector.broadcast %176 : vector<16x1xf32> to vector<16x32xf32>
    %185 = arith.subf %172, %184 : vector<16x32xf32>
    %cst_50 = arith.constant 9.99999996E-13 : f32
    %186 = vector.broadcast %cst_50 : f32 to vector<16x1xf32>
    %187 = arith.addf %183, %186 : vector<16x1xf32>
    %188 = math.rsqrt %187 : vector<16x1xf32>
    %189 = vector.broadcast %188 : vector<16x1xf32> to vector<16x32xf32>
    %190 = arith.mulf %185, %189 : vector<16x32xf32>
    %191 = vector.broadcast %12 : vector<1x32xf32> to vector<16x32xf32>
    %192 = arith.mulf %190, %191 : vector<16x32xf32>
    %193 = vector.broadcast %13 : vector<1x32xf32> to vector<16x32xf32>
    %194 = arith.addf %192, %193 : vector<16x32xf32>
    %c0_51 = arith.constant 0 : index
    %c0_52 = arith.constant 0 : index
    %195 = vector.load %arg5[%c0_51, %c0_52] : memref<16x32xf32, #tpu.memory_space<vmem>>, vector<16x32xf32>
    tpu.vector_store %arg5[%c0_51, %c0_52], %194 {strides = array<i32>} : memref<16x32xf32, #tpu.memory_space<vmem>>, vector<16x32xf32>,
    %196 = vector.extract_strided_slice %2 {offsets = [0, 192], sizes = [32, 32], strides = [1, 1]} : vector<32x224xbf16> to vector<32x32xbf16>
    %197 = arith.truncf %194 : vector<16x32xf32> to vector<16x32xbf16>
    %cst_53 = arith.constant dense<0.000000e+00> : vector<16x32xf32>
    %198 = tpu.matmul %197, %196, %cst_53 {dimension_numbers = #tpu.dot_dimension_numbers<[1], [0], [0], [1], [0, 0, 1, 1], [], []>} : vector<16x32xbf16>, vector<32x32xbf16>, vector<16x32xf32> -> vector<16x32xf32>
    %199 = vector.broadcast %14 : vector<1x32xf32> to vector<16x32xf32>
    %200 = arith.addf %198, %199 : vector<16x32xf32>
    %201 = math.tanh %200 : vector<16x32xf32>
    %202 = vector.extract_strided_slice %201 {offsets = [0, 0], sizes = [1, 32], strides = [1, 1]} : vector<16x32xf32> to vector<1x32xf32>
    %c0_54 = arith.constant 0 : index
    %c0_55 = arith.constant 0 : index
    %203 = vector.load %arg6[%c0_54, %c0_55] : memref<2x32xf32, #tpu.memory_space<vmem>>, vector<1x32xf32>
    tpu.vector_store %arg6[%c0_54, %c0_55], %202 {strides = array<i32>} : memref<2x32xf32, #tpu.memory_space<vmem>>, vector<1x32xf32>,
    %204 = vector.extract_strided_slice %201 {offsets = [8, 0], sizes = [1, 32], strides = [1, 1]} : vector<16x32xf32> to vector<1x32xf32>
    %c1 = arith.constant 1 : index
    %c0_56 = arith.constant 0 : index
    %205 = vector.load %arg6[%c1, %c0_56] : memref<2x32xf32, #tpu.memory_space<vmem>>, vector<1x32xf32>
    tpu.vector_store %arg6[%c1, %c0_56], %204 {strides = array<i32>} : memref<2x32xf32, #tpu.memory_space<vmem>>, vector<1x32xf32>,
    return
  }
}

</mosaic_0001>

<bundles_post_ra>
// kernel: text_encoder_forward.1
= control target key start
LH: loop header
LB: loop body
LE: loop exit
PB: predicated region body
PF: predicated region fallthrough
CT: control target
= control target key end

     0   :  { %12 = vsyncpa [#allocation3], 0  ;;  %vm35_vm0 = vcmask 261120   ;;  %s1385_s0 = inlined_call_operand.vmem [shape: f32[16,32], index: 0, kind: input, shape index: {}]   ;;  %s1386_s1 = inlined_call_operand.vmem [shape: f32[32,128], index: 1, kind: input, shape index: {}]   ;;  %s1387_s2 = inlined_call_operand.vmem [shape: bf16[32,224], index: 2, kind: input, shape index: {}]   ;;  %s1388_s3 = inlined_call_operand.vmem [shape: bf16[32,128], index: 3, kind: input, shape index: {}]   ;;  %s1389_s4 = inlined_call_operand.vmem [shape: bf16[128,32], index: 4, kind: input, shape index: {}]   ;;  %s1390_s5 = inlined_call_operand.hbm [shape: f32[16,32], index: 5, kind: output, shape index: {0}]   ;;  %s1391_s6 = inlined_call_operand.hbm [shape: f32[2,32], index: 6, kind: output, shape index: {1}]  }
   0x1   :  { %v25_v0 = vld [vmem:[%s1385_s0] sm:$0xff] }
   0x2   :  { %13 = vsyncpa [#allocation5], 0  ;;  %v36_v1 = vsel %vm35_vm0, %v25_v0, 0.0  ;;  %v26_v2 = vld [vmem:[%s1385_s0 + $0x8] sm:$0xff]  ;;  %v1093_v4 = vmov 32.0   ;;  %v1191_v50 = vld [vmem:[%s1386_s1] sm:$0xff] }
   0x3   :  { %37 = vadd.xlane.f32.xlu0 %v36_v1  ;;  %v39_v3 = vsel %vm35_vm0, %v26_v2, 0.0  ;;  %987 = vrcp.f32 %v1093_v4  ;;  %v866_v21 = vld [vmem:[%s1387_s2 + $0x10] sm:$0xf]  ;;  %v943_v22 = vld [vmem:[%s1387_s2 + $0x14] sm:$0xf0]  ;;  %v87_v53 = vperm.slane %v1191_v50, 0 }
   0x4   :  { %v942_v23 = vld [vmem:[%s1387_s2 + $0x14] sm:$0xf]  ;;  %v867_v24 = vor.u32 %v943_v22, %v866_v21  ;;  %v868_v25 = vld [vmem:[%s1387_s2 + $0x18] sm:$0xf0]  ;;  %v858_v27 = vld [vmem:[%s1387_s2] sm:$0xf] }
   0x5   :  { %v1168_v26 = vor.u32 %v942_v23, %v868_v25  ;;  %v941_v28 = vld [vmem:[%s1387_s2 + $0x4] sm:$0xf0]  ;;  %v940_v29 = vld [vmem:[%s1387_s2 + $0x4] sm:$0xf]  ;;  %v860_v32 = vld [vmem:[%s1387_s2 + $0x8] sm:$0xf0] }
   0x6   :  { %123 = vmatpush.bf16.msra.mxu0 %v867_v24  ;;  %v859_v31 = vor.u32 %v941_v28, %v858_v27  ;;  %v1184_v34 = vor.u32 %v940_v29, %v860_v32  ;;  %v90_v58 = vperm.slane %v1191_v50, 1  ;;  %v145_v63 = vperm.slane %v1191_v50, 2  ;;  %s1094_s17 = smov 88   ;;  %s1095_s18 = smov 80   ;;  %v1252_v22 = vld [vmem:[%s1386_s1 + $0x10] sm:$0xff] }
   0x7   :  { %137 = vmatpush.bf16.msra.mxu1 %v1168_v26  ;;  %s1096_s19 = smov 96   ;;  %s1097_s20 = smov 120   ;;  %vm154_vm8 = vcmask 64512   ;;  %vm190_vm9 = vcmask 130048  }
   0x8   :  { %s1098_s21 = smov 112   ;;  %s1099_s22 = smov 32  }
   0x9   :  { %v988_v5 = vpop.eup %987  ;;  %s1100_s23 = smov 72   ;;  %s1101_s24 = smov 104  }
   0xa   :  { %v43_v6 = vmul.f32 32.0, %v988_v5  ;;  %vm47_vm1 = vweird.f32 %v988_v5  ;;  %124 = vmatpush.bf16.msra.mxu0 %v859_v31  ;;  %s1102_s28 = smov 64   ;;  %s828_s0 = sshll.u32 %s1390_s5, 4  ;;  %s829_s0 = int_to_ptr.hbm [resolvable:$true] %s828_s0 }
   0xb   :  { %40 = vadd.xlane.f32.xlu0 %v39_v3  ;;  %138 = vmatpush.bf16.msra.mxu1 %v1184_v34  ;;  %s1103_s25 = smov [#allocation2]   ;;  %s1104_s27 = smov 128  }
   0xc   :  { %v44_v7 = vsub.f32 1.0, %v43_v6  ;;  %s826_s26 = sshll.u32 %s1103_s25, 4  ;;  %s1106_s29 = smov [#allocation4]   ;;  %s827_s26 = int_to_ptr.vmem [resolvable:$true] %s826_s26 }
   0xd   :  { %s840_s30 = sshll.u32 %s1106_s29, 4  ;;  %s842_s8 = sshll.u32 %s1391_s6, 4  ;;  %s841_s30 = int_to_ptr.vmem [resolvable:$true] %s840_s30  ;;  %s843_s8 = int_to_ptr.hbm [resolvable:$true] %s842_s8 }
   0xe   :  { %v45_v8 = vmul.f32 %v988_v5, %v44_v7 }
  0x10   :  { %v46_v9 = vadd.f32 %v988_v5, %v45_v8 }
  0x12   :  { %v1150_v10 = vsel %vm47_vm1, %v988_v5, %v46_v9 }
  0x76   :  { %v38_v11 = vpop.xlane.xlu0 %37 }
  0x77   :  { %v49_v12 = vmul.f32 %v1150_v10, %v38_v11 }
  0x79   :  { %v51_v13 = vsub.f32 %v25_v0, %v49_v12 }
  0x7b   :  { %v53_v14 = vmul.f32 %v51_v13, %v51_v13 }
  0x7d   :  { %v55_v15 = vsel %vm35_vm0, %v53_v14, 0.0 }
  0x7e   :  { %56 = vadd.xlane.f32.xlu1 %v55_v15  ;;  %v41_v16 = vpop.xlane.xlu0 %40 }
  0x7f   :  { %v50_v17 = vmul.f32 %v1150_v10, %v41_v16 }
  0x81   :  { %v52_v18 = vsub.f32 %v26_v2, %v50_v17 }
  0x83   :  { %v54_v19 = vmul.f32 %v52_v18, %v52_v18 }
  0x85   :  { %v58_v20 = vsel %vm35_vm0, %v54_v19, 0.0 }
  0x86   :  { %59 = vadd.xlane.f32.xlu1 %v58_v20 }
  0xf1   :  { %v57_v30 = vpop.xlane.xlu1 %56 }
  0xf2   :  { %v61_v33 = vmul.f32 %v57_v30, %v1150_v10 }
  0xf4   :  { %v63_v35 = vadd.f32 1e-12, %v61_v33 }
  0xf6   :  { %989 = vrsqrt.f32 %v63_v35  ;;  %vm71_vm3 = vweird.f32 %v63_v35 }
  0xf9   :  { %v60_v36 = vpop.xlane.xlu1 %59 }
  0xfa   :  { %v62_v37 = vmul.f32 %v60_v36, %v1150_v10 }
  0xfc   :  { %v990_v38 = vpop.eup %989  ;;  %v64_v39 = vadd.f32 1e-12, %v62_v37 }
  0xfd   :  { %v66_v40 = vmul.f32 %v990_v38, %v63_v35  ;;  %vm72_vm2 = vweird.f32 %v990_v38  ;;  %v1263_v35 = vld [vmem:[%s1386_s1 + $0x18] sm:$0xff] }
  0xfe   :  { %991 = vrsqrt.f32 %v64_v39  ;;  %vm73_vm4 = vmor %vm71_vm3, %vm72_vm2  ;;  %vm81_vm6 = vweird.f32 %v64_v39 }
  0xff   :  { %v67_v41 = vmul.f32 %v990_v38, %v66_v40 }
 0x101   :  { %v68_v42 = vmul.f32 0.5, %v67_v41 }
 0x103   :  { %v69_v43 = vsub.f32 1.5, %v68_v42 }
 0x104   :  { %v992_v44 = vpop.eup %991 }
 0x105   :  { %v70_v45 = vmul.f32 %v990_v38, %v69_v43  ;;  %v76_v46 = vmul.f32 %v992_v44, %v64_v39  ;;  %vm82_vm5 = vweird.f32 %v992_v44 }
 0x106   :  { %vm83_vm7 = vmor %vm81_vm6, %vm82_vm5 }
 0x107   :  { %v77_v47 = vmul.f32 %v992_v44, %v76_v46  ;;  %v74_v48 = vsel %vm73_vm4, %v990_v38, %v70_v45 }
 0x108   :  { %v85_v52 = vmul.f32 %v74_v48, %v51_v13 }
 0x109   :  { %v78_v49 = vmul.f32 0.5, %v77_v47 }
 0x10a   :  { %v88_v57 = vmul.f32 %v87_v53, %v85_v52 }
 0x10b   :  { %v79_v51 = vsub.f32 1.5, %v78_v49 }
 0x10c   :  { %v1195_v60 = vadd.f32 %v90_v58, %v88_v57 }
 0x10d   :  { %v80_v54 = vmul.f32 %v992_v44, %v79_v51 }
 0x10f   :  { %v84_v55 = vsel %vm83_vm7, %v992_v44, %v80_v54  ;;  %vm819_vm7 = vcmask 253952  }
 0x110   :  { %v86_v56 = vmul.f32 %v84_v55, %v52_v18 }
 0x112   :  { %v89_v59 = vmul.f32 %v87_v53, %v86_v56 }
 0x114   :  { %v1197_v61 = vadd.f32 %v90_v58, %v89_v59 }
 0x116   :  { %v93_v62 = vpack.c.bf16 %v1197_v61, %v1195_v60 }
 0x118   :  { %872 = vmatmul.msk.bf16.vlgmr.msra.gmra.mxu0 %vm35_vm0, %v93_v62  ;;  %873 = vmatmul.msk.bf16.vlgmr.msra.gmra.mxu1 %vm35_vm0, %v93_v62 }
 0x195   :  { %v126_v0 = vpop.f32.mrf.mxu0  ;;  %v1231_v8 = vpop.f32.mrf.mxu1 }
 0x196   :  { %v1204_v1 = vadd.f32 %v145_v63, %v126_v0 }
 0x198   :  { %217 = vrot.lane.b32.xlu1 %v1204_v1, %s1094_s17 }
 0x19d   :  { %v128_v2 = vpop.f32.mrf.mxu0  ;;  %v1237_v12 = vpop.f32.mrf.mxu1 }
 0x19e   :  { %v1207_v3 = vadd.f32 %v145_v63, %v128_v2  ;;  %v1219_v4 = vpack.i.bf16 %v126_v0, %v128_v2 }
 0x1a0   :  { %356 = vrot.lane.b32.xlu1 %v1207_v3, %s1095_s18  ;;  %219 = vrot.lane.b32.xlu0 %v1207_v3, %s1094_s17 }
 0x1a1   :  { %152 = vrot.lane.b32.xlu2 %v1207_v3, %s1096_s19 }
 0x1a8   :  { %354 = vrot.lane.b32.xlu1 %v1204_v1, %s1095_s18  ;;  %215 = vrot.lane.b32.xlu0 %v1207_v3, %s1097_s20 }
 0x1a9   :  { %150 = vrot.lane.b32.xlu2 %v1204_v1, %s1096_s19 }
 0x1b0   :  { %350 = vrot.lane.b32.xlu1 %v1204_v1, %s1098_s21 }
 0x1b1   :  { %213 = vrot.lane.b32.xlu2 %v1204_v1, %s1097_s20 }
 0x1b8   :  { %973 = vrot.lane.b32.xlu1 %v1219_v4, %s1099_s22 }
 0x1c0   :  { %352 = vrot.lane.b32.xlu1 %v1207_v3, %s1098_s21 }
 0x1c8   :  { %450 = vrot.lane.b32.xlu1 %v1204_v1, %s1100_s23 }
 0x1d0   :  { %448 = vrot.lane.b32.xlu1 %v1207_v3, %s1101_s24 }
 0x1fb   :  { %v153_v5 = vpop.permute.xlu2 %152 }
 0x1fc   :  { %874 = vmatpush.xpose.msk.msra.mxu2 %vm154_vm8, %v153_v5 }
 0x203   :  { %v151_v6 = vpop.permute.xlu2 %150 }
 0x204   :  { %875 = vmatpush.xpose.msk.msra.mxu2 %vm154_vm8, %v151_v6 }
 0x207   :  { %876 = vmatmul.msk.f32.vlgmr.msra.gmra.mxu2 %vm154_vm8, %v1204_v1 }
 0x20a   :  { %v218_v7 = vpop.permute.xlu1 %217 }
 0x20b   :  { %v214_v13 = vpop.permute.xlu2 %213 }
 0x20f   :  { %877 = vmatmul.msk.f32.gmra.mxu2 %vm154_vm8, %v1207_v3 }
 0x212   :  { %v357_v9 = vpop.permute.xlu1 %356  ;;  %v220_v11 = vpop.permute.xlu0 %219 }
 0x213   :  { %878 = vmatpush.xpose.msk.msrb.mxu2 %vm154_vm8, %v220_v11  ;;  %954 = vmatpush.xpose.msk.msra.mxu3 %vm154_vm8, %v220_v11 }
 0x217   :  { %879 = vmatpush.xpose.msk.msrb.mxu2 %vm154_vm8, %v218_v7  ;;  %955 = vmatpush.xpose.msk.msra.mxu3 %vm154_vm8, %v218_v7 }
 0x21a   :  { %v355_v14 = vpop.permute.xlu1 %354  ;;  %v216_v15 = vpop.permute.xlu0 %215  ;;  %880 = vmatmul.msk.f32.vlgmr.msrb.gmra.mxu2 %vm154_vm8, %v214_v13 }
 0x21b   :  { %886 = vmatpush.xpose.msk.msra.mxu2 %vm154_vm8, %v357_v9  ;;  %435 = vmatpush.msrb.mxu3 %v1237_v12 }
 0x21c   :  { %881 = vmatmul.msk.f32.vlgmr.msra.gmra.mxu3 %vm154_vm8, %v216_v15 }
 0x21d   :  { %436 = vmatpush.msrb.mxu3 %v1231_v8 }
 0x21f   :  { %887 = vmatpush.xpose.msk.msra.mxu2 %vm154_vm8, %v355_v14 }
 0x222   :  { %v351_v16 = vpop.permute.xlu1 %350 }
 0x223   :  { %888 = vmatmul.msk.f32.vlgmr.msra.gmra.mxu2 %vm154_vm8, %v351_v16 }
 0x22a   :  { %v974_v17 = vpop.permute.xlu1 %973 }
 0x22b   :  { %v975_v18 = vunpack.i.l.bf16 %v974_v17  ;;  %v976_v19 = vunpack.i.h.bf16 %v974_v17 }
 0x22d   :  { %306 = vmatpush.msrb.mxu0 %v975_v18  ;;  %956 = vmatpush.msrb.mxu1 %v975_v18 }
 0x22f   :  { %307 = vmatpush.msrb.mxu0 %v976_v19  ;;  %957 = vmatpush.msrb.mxu1 %v976_v19 }
 0x232   :  { %v353_v20 = vpop.permute.xlu1 %352 }
 0x233   :  { %889 = vmatmul.msk.f32.gmra.mxu2 %vm154_vm8, %v353_v20 }
 0x23a   :  { %v451_v52 = vpop.permute.xlu1 %450 }
 0x242   :  { %v449_v54 = vpop.permute.xlu1 %448 }
 0x28a   :  { %v180_v21 = vpop.f32.mrf.mxu2 }
 0x28b   :  { %v186_v23 = vmul.f32 0.35355338, %v180_v21 }
 0x28d   :  { %v188_v24 = vadd.f32 %v186_v23, %v1252_v22 }
 0x28f   :  { %v191_v25 = vsel %vm190_vm9, %v188_v24, -inf }
 0x290   :  { %192 = vmax.xlane.f32.xlu1 %v191_v25 }
 0x292   :  { %v183_v27 = vpop.f32.mrf.mxu2 }
 0x293   :  { %v187_v58 = vmul.f32 0.35355338, %v183_v27 }
 0x295   :  { %v189_v62 = vadd.f32 %v187_v58, %v1263_v35 }
 0x297   :  { %v194_v2 = vsel %vm190_vm9, %v189_v62, -inf }
 0x29d   :  { %v246_v28 = vpop.f32.mrf.mxu2 }
 0x29e   :  { %v252_v29 = vmul.f32 0.35355338, %v246_v28 }
 0x29f   :  { %v249_v32 = vpop.f32.mrf.mxu3 }
 0x2a0   :  { %v254_v30 = vadd.f32 %v252_v29, %v1252_v22  ;;  %v253_v33 = vmul.f32 0.35355338, %v249_v32 }
 0x2a2   :  { %v256_v31 = vsel %vm190_vm9, %v254_v30, -inf  ;;  %v255_v36 = vadd.f32 %v253_v33, %v1263_v35 }
 0x2a3   :  { %257 = vmax.xlane.f32.xlu2 %v256_v31 }
 0x2a4   :  { %v259_v39 = vsel %vm190_vm9, %v255_v36, -inf }
 0x2a6   :  { %v383_v37 = vpop.f32.mrf.mxu2 }
 0x2a7   :  { %v389_v38 = vmul.f32 0.35355338, %v383_v37 }
 0x2a9   :  { %v391_v40 = vadd.f32 %v389_v38, %v1252_v22 }
 0x2ab   :  { %v393_v43 = vsel %vm190_vm9, %v391_v40, -inf }
 0x2b6   :  { %v386_v41 = vpop.f32.mrf.mxu2 }
 0x2b7   :  { %v390_v42 = vmul.f32 0.35355338, %v386_v41 }
 0x2b9   :  { %v1270_v44 = vadd.f32 %v390_v42, %v1263_v35 }
 0x2bb   :  { %452 = vrot.lane.b32.xlu2 %v1207_v3, %s1100_s23  ;;  %v396_v45 = vsel %vm190_vm9, %v1270_v44, -inf }
 0x2e4   :  { %260 = vmax.xlane.f32.xlu2 %v259_v39 }
 0x2ec   :  { %394 = vmax.xlane.f32.xlu2 %v393_v43 }
 0x2f4   :  { %397 = vmax.xlane.f32.xlu2 %v396_v45 }
 0x303   :  { %v193_v55 = vpop.xlane.xlu1 %192 }
 0x304   :  { %v197_v56 = vsub.f32 %v188_v24, %v193_v55 }
 0x306   :  { %v199_v59 = vmul.f32 1.442695, %v197_v56 }
 0x316   :  { %v258_v46 = vpop.xlane.xlu2 %257 }
 0x317   :  { %v262_v47 = vsub.f32 %v254_v30, %v258_v46 }
 0x319   :  { %v264_v48 = vmul.f32 1.442695, %v262_v47 }
 0x31b   :  { %993 = vpow2.f32 %v264_v48 }
 0x31c   :  { %995 = vpow2.f32 %v199_v59 }
 0x31e   :  { %v453_v49 = vpop.permute.xlu2 %452 }
 0x31f   :  { %892 = vmatpush.xpose.msk.msra.mxu0 %vm154_vm8, %v453_v49 }
 0x321   :  { %v994_v51 = vpop.eup %993 }
 0x322   :  { %v268_v53 = vsel %vm190_vm9, %v994_v51, 0.0  ;;  %v1281_v5 = vpop.eup %995 }
 0x323   :  { %269 = vadd.xlane.f32.xlu0 %v268_v53  ;;  %893 = vmatpush.xpose.msk.msra.mxu0 %vm154_vm8, %v451_v52 }
 0x337   :  { %446 = vrot.lane.b32.xlu0 %v1204_v1, %s1101_s24  ;;  %v203_v1 = vsel %vm190_vm9, %v1281_v5, 0.0 }
 0x357   :  { %v261_v57 = vpop.xlane.xlu2 %260 }
 0x358   :  { %v263_v21 = vsub.f32 %v255_v36, %v261_v57 }
 0x35a   :  { %v266_v23 = vmul.f32 1.442695, %v263_v21 }
 0x35f   :  { %v395_v63 = vpop.xlane.xlu2 %394 }
 0x360   :  { %v399_v0 = vsub.f32 %v391_v40, %v395_v63 }
 0x361   :  { %195 = vmax.xlane.f32.xlu0 %v194_v2 }
 0x362   :  { %v401_v3 = vmul.f32 1.442695, %v399_v0 }
 0x364   :  { %997 = vpow2.f32 %v401_v3 }
 0x367   :  { %v398_v32 = vpop.xlane.xlu2 %397 }
 0x368   :  { %v400_v39 = vsub.f32 %v1270_v44, %v398_v32 }
 0x369   :  { %204 = vadd.xlane.f32.xlu0 %v203_v1 }
 0x36a   :  { %v998_v6 = vpop.eup %997 }
 0x36b   :  { %v405_v7 = vsel %vm190_vm9, %v998_v6, 0.0 }
 0x371   :  { %406 = vadd.xlane.f32.xlu0 %v405_v7 }
 0x396   :  { %v270_v9 = vpop.xlane.xlu0 %269 }
 0x397   :  { %999 = vrcp.f32 %v270_v9 }
 0x39d   :  { %v1000_v11 = vpop.eup %999 }
 0x39e   :  { %v276_v13 = vmul.f32 %v1000_v11, %v994_v51 }
 0x3a0   :  { %882 = vmatmul.msk.f32.vlgmr.msrb.gmra.mxu0 %vm190_vm9, %v276_v13 }
 0x3a9   :  { %v447_v14 = vpop.permute.xlu0 %446 }
 0x3aa   :  { %894 = vmatmul.msk.f32.vlgmr.msra.gmra.mxu0 %vm154_vm8, %v447_v14 }
 0x3b2   :  { %895 = vmatmul.msk.f32.gmra.mxu0 %vm154_vm8, %v449_v54 }
 0x3d4   :  { %v196_v15 = vpop.xlane.xlu0 %195 }
 0x3d5   :  { %v198_v28 = vsub.f32 %v189_v62, %v196_v15 }
 0x3d7   :  { %v201_v30 = vmul.f32 1.442695, %v198_v28 }
 0x3dc   :  { %v205_v16 = vpop.xlane.xlu0 %204 }
 0x3e4   :  { %v407_v17 = vpop.xlane.xlu0 %406 }
 0x3e5   :  { %1001 = vrcp.f32 %v407_v17 }
 0x3e6   :  { %1003 = vpow2.f32 %v266_v23 }
 0x3e7   :  { %1005 = vpow2.f32 %v201_v30 }
 0x3eb   :  { %v1002_v18 = vpop.eup %1001 }
 0x3ec   :  { %v413_v19 = vmul.f32 %v1002_v18, %v998_v6  ;;  %v1004_v37 = vpop.eup %1003 }
 0x3ed   :  { %v271_v40 = vsel %vm190_vm9, %v1004_v37, 0.0  ;;  %v1006_v41 = vpop.eup %1005 }
 0x3ee   :  { %890 = vmatmul.msk.f32.vlgmr.msrb.gmra.mxu3 %vm190_vm9, %v413_v19  ;;  %v206_v42 = vsel %vm190_vm9, %v1006_v41, 0.0 }
 0x41d   :  { %v1290_v20 = vpop.f32.mrf.mxu0 }
 0x427   :  { %v479_v24 = vpop.f32.mrf.mxu0 }
 0x428   :  { %v485_v25 = vmul.f32 0.35355338, %v479_v24 }
 0x42a   :  { %v487_v27 = vadd.f32 %v485_v25, %v1252_v22  ;;  %v403_v22 = vmul.f32 1.442695, %v400_v39 }
 0x42c   :  { %v489_v29 = vsel %vm190_vm9, %v487_v27, -inf  ;;  %1007 = vpow2.f32 %v403_v22 }
 0x42d   :  { %490 = vmax.xlane.f32.xlu1 %v489_v29 }
 0x42f   :  { %v482_v31 = vpop.f32.mrf.mxu0 }
 0x430   :  { %v486_v33 = vmul.f32 0.35355338, %v482_v31 }
 0x432   :  { %v488_v38 = vadd.f32 %v486_v33, %v1263_v35  ;;  %v1008_v43 = vpop.eup %1007  ;;  %v982_v35 = vpack.i.bf16 %v1231_v8, %v1237_v12 }
 0x433   :  { %v408_v45 = vsel %vm190_vm9, %v1008_v43, 0.0 }
 0x434   :  { %v492_v36 = vsel %vm190_vm9, %v488_v38, -inf }
 0x435   :  { %493 = vmax.xlane.f32.xlu2 %v492_v36  ;;  %272 = vadd.xlane.f32.xlu1 %v271_v40 }
 0x43d   :  { %207 = vadd.xlane.f32.xlu1 %v206_v42 }
 0x445   :  { %409 = vadd.xlane.f32.xlu1 %v408_v45 }
 0x44d   :  { %978 = vrot.lane.b32.xlu2 %v1219_v4, %s1102_s28 }
 0x45e   :  { %983 = vrot.lane.b32.xlu1 %v982_v35, %s1096_s19 }
 0x471   :  { %v438_v24 = vpop.f32.mrf.mxu3 }
 0x4a0   :  { %v491_v44 = vpop.xlane.xlu1 %490 }
 0x4a1   :  { %v495_v46 = vsub.f32 %v487_v27, %v491_v44  ;;  %v550_v27 = vperm.slane %v1191_v50, 3 }
 0x4a3   :  { %v497_v47 = vmul.f32 1.442695, %v495_v46 }
 0x4a5   :  { %1009 = vpow2.f32 %v497_v47 }
 0x4a8   :  { %v273_v48 = vpop.xlane.xlu1 %272  ;;  %v494_v49 = vpop.xlane.xlu2 %493 }
 0x4a9   :  { %1011 = vrcp.f32 %v273_v48  ;;  %v496_v51 = vsub.f32 %v488_v38, %v494_v49 }
 0x4ab   :  { %v1010_v52 = vpop.eup %1009  ;;  %v499_v53 = vmul.f32 1.442695, %v496_v51 }
 0x4ac   :  { %v501_v54 = vsel %vm190_vm9, %v1010_v52, 0.0 }
 0x4ad   :  { %1013 = vpow2.f32 %v499_v53  ;;  %502 = vadd.xlane.f32.xlu0 %v501_v54  ;;  %v944_v53 = vld [vmem:[%s1388_s3] sm:$0xff] }
 0x4ae   :  { %1015 = vrcp.f32 %v205_v16 }
 0x4af   :  { %v1012_v4 = vpop.eup %1011 }
 0x4b0   :  { %v208_v55 = vpop.xlane.xlu1 %207  ;;  %v979_v8 = vpop.permute.xlu2 %978  ;;  %v277_v12 = vmul.f32 %v1012_v4, %v1004_v37 }
 0x4b1   :  { %v980_v56 = vunpack.i.l.bf16 %v979_v8  ;;  %v981_v58 = vunpack.i.h.bf16 %v979_v8  ;;  %1017 = vrcp.f32 %v208_v55 }
 0x4b2   :  { %883 = vmatmul.msk.f32.vlgmr.msrb.gmra.mxu1 %vm190_vm9, %v277_v12 }
 0x4b3   :  { %v1014_v57 = vpop.eup %1013  ;;  %341 = vmatpush.msra.mxu1 %v980_v56 }
 0x4b4   :  { %v504_v59 = vsel %vm190_vm9, %v1014_v57, 0.0  ;;  %v1016_v62 = vpop.eup %1015 }
 0x4b5   :  { %505 = vadd.xlane.f32.xlu0 %v504_v59  ;;  %342 = vmatpush.msra.mxu1 %v981_v58  ;;  %v211_v63 = vmul.f32 %v1016_v62, %v1281_v5 }
 0x4b7   :  { %v1018_v2 = vpop.eup %1017 }
 0x4b8   :  { %v410_v0 = vpop.xlane.xlu1 %409  ;;  %v212_v1 = vmul.f32 %v1018_v2, %v1006_v41 }
 0x4b9   :  { %1019 = vrcp.f32 %v410_v0 }
 0x4ba   :  { %884 = vmatmul.msk.f32.vlgmr.msra.gmra.mxu1 %vm190_vm9, %v211_v63 }
 0x4bf   :  { %v1020_v3 = vpop.eup %1019 }
 0x4c0   :  { %v414_v6 = vmul.f32 %v1020_v3, %v1008_v43 }
 0x4c2   :  { %885 = vmatmul.msk.f32.gmra.mxu1 %vm190_vm9, %v212_v1  ;;  %891 = vmatmul.msk.f32.gmra.mxu3 %vm190_vm9, %v414_v6  ;;  %v599_v6 = vperm.slane %v1191_v50, 4 }
 0x4d0   :  { %v984_v7 = vpop.permute.xlu1 %983 }
 0x4d1   :  { %v985_v9 = vunpack.i.l.bf16 %v984_v7  ;;  %v986_v11 = vunpack.i.h.bf16 %v984_v7 }
 0x4d3   :  { %539 = vmatpush.msrb.mxu1 %v985_v9 }
 0x4d5   :  { %540 = vmatpush.msrb.mxu1 %v986_v11 }
 0x520   :  { %v503_v13 = vpop.xlane.xlu0 %502 }
 0x521   :  { %1021 = vrcp.f32 %v503_v13  ;;  %v602_v13 = vperm.slane %v1191_v50, 5 }
 0x527   :  { %v1022_v5 = vpop.eup %1021 }
 0x528   :  { %v509_v14 = vmul.f32 %v1022_v5, %v1010_v52  ;;  %v506_v15 = vpop.xlane.xlu0 %505 }
 0x529   :  { %1023 = vrcp.f32 %v506_v15 }
 0x52a   :  { %896 = vmatmul.msk.f32.vlgmr.msrb.gmra.mxu1 %vm190_vm9, %v509_v14 }
 0x52f   :  { %v1024_v16 = vpop.eup %1023  ;;  %v312_v18 = vpop.f32.mrf.mxu1 }
 0x530   :  { %v510_v17 = vmul.f32 %v1024_v16, %v1014_v57 }
 0x532   :  { %897 = vmatmul.msk.f32.gmra.mxu1 %vm190_vm9, %v510_v17 }
 0x537   :  { %v344_v19 = vpop.f32.mrf.mxu1 }
 0x538   :  { %v345_v23 = vadd.f32 %v344_v19, %v1290_v20  ;;  %v953_v19 = vld [vmem:[%s1389_s4 + $0x38] sm:$0xff] }
 0x539   :  { %724 = vmatpush.bf16.msra.mxu3 %v953_v19 }
 0x53a   :  { %v444_v25 = vadd.f32 %v438_v24, %v345_v23  ;;  %v951_v23 = vld [vmem:[%s1389_s4 + $0x28] sm:$0xff]  ;;  %v950_v24 = vld [vmem:[%s1389_s4 + $0x20] sm:$0xff] }
 0x53f   :  { %v347_v21 = vpop.f32.mrf.mxu1 }
 0x540   :  { %v348_v32 = vadd.f32 %v347_v21, %v312_v18  ;;  %v952_v21 = vld [vmem:[%s1389_s4 + $0x30] sm:$0xff] }
 0x541   :  { %725 = vmatpush.bf16.msra.mxu3 %v952_v21 }
 0x545   :  { %v441_v31 = vpop.f32.mrf.mxu3  ;;  %726 = vmatpush.bf16.msra.mxu3 %v951_v23 }
 0x546   :  { %v445_v37 = vadd.f32 %v441_v31, %v348_v32 }
 0x549   :  { %727 = vmatpush.bf16.msra.mxu3 %v950_v24 }
 0x5a7   :  { %v542_v28 = vpop.f32.mrf.mxu1 }
 0x5a8   :  { %v548_v29 = vadd.f32 %v542_v28, %v444_v25  ;;  %v949_v25 = vld [vmem:[%s1389_s4 + $0x18] sm:$0xff]  ;;  %v947_v28 = vld [vmem:[%s1389_s4 + $0x8] sm:$0xff] }
 0x5a9   :  { %728 = vmatpush.bf16.msra.mxu3 %v949_v25 }
 0x5aa   :  { %v551_v30 = vadd.f32 %v550_v27, %v548_v29  ;;  %v946_v29 = vld [vmem:[%s1389_s4] sm:$0xff] }
 0x5ac   :  { %v553_v33 = vadd.f32 %v551_v30, %v1195_v60  ;;  %v610_v30 = vperm.slane %v1191_v50, 6 }
 0x5ae   :  { %v555_v38 = vsel %vm35_vm0, %v553_v33, 0.0 }
 0x5af   :  { %v545_v39 = vpop.f32.mrf.mxu1  ;;  %556 = vadd.xlane.f32.xlu2 %v555_v38 }
 0x5b0   :  { %v549_v36 = vadd.f32 %v545_v39, %v445_v37 }
 0x5b2   :  { %v552_v40 = vadd.f32 %v550_v27, %v549_v36  ;;  %v948_v27 = vld [vmem:[%s1389_s4 + $0x10] sm:$0xff] }
 0x5b3   :  { %729 = vmatpush.bf16.msra.mxu3 %v948_v27 }
 0x5b4   :  { %v554_v20 = vadd.f32 %v552_v40, %v1197_v61  ;;  %v945_v61 = vld [vmem:[%s1388_s3 + $0x8] sm:$0xff] }
 0x5b5   :  { %632 = vmatpush.bf16.msrb.mxu2 %v945_v61 }
 0x5b6   :  { %v558_v22 = vsel %vm35_vm0, %v554_v20, 0.0 }
 0x5b7   :  { %559 = vadd.xlane.f32.xlu0 %v558_v22  ;;  %730 = vmatpush.bf16.msra.mxu3 %v947_v28 }
 0x5b9   :  { %633 = vmatpush.bf16.msrb.mxu2 %v944_v53 }
 0x5bb   :  { %731 = vmatpush.bf16.msra.mxu3 %v946_v29 }
 0x622   :  { %v557_v41 = vpop.xlane.xlu2 %556 }
 0x623   :  { %v561_v42 = vmul.f32 %v557_v41, %v1150_v10 }
 0x625   :  { %v563_v43 = vsub.f32 %v553_v33, %v561_v42 }
 0x627   :  { %v565_v45 = vmul.f32 %v563_v43, %v563_v43 }
 0x629   :  { %v567_v35 = vsel %vm35_vm0, %v565_v45, 0.0 }
 0x62a   :  { %v560_v60 = vpop.xlane.xlu0 %559  ;;  %568 = vadd.xlane.f32.xlu0 %v567_v35 }
 0x62b   :  { %v562_v44 = vmul.f32 %v560_v60, %v1150_v10 }
 0x62d   :  { %v564_v46 = vsub.f32 %v554_v20, %v562_v44 }
 0x62f   :  { %v566_v47 = vmul.f32 %v564_v46, %v564_v46 }
 0x631   :  { %v570_v48 = vsel %vm35_vm0, %v566_v47, 0.0 }
 0x632   :  { %571 = vadd.xlane.f32.xlu0 %v570_v48 }
 0x69d   :  { %v569_v49 = vpop.xlane.xlu0 %568 }
 0x69e   :  { %v573_v51 = vmul.f32 %v569_v49, %v1150_v10 }
 0x6a0   :  { %v575_v52 = vadd.f32 1e-12, %v573_v51 }
 0x6a2   :  { %1025 = vrsqrt.f32 %v575_v52  ;;  %vm583_vm11 = vweird.f32 %v575_v52 }
 0x6a5   :  { %v572_v54 = vpop.xlane.xlu0 %571 }
 0x6a6   :  { %v574_v4 = vmul.f32 %v572_v54, %v1150_v10 }
 0x6a8   :  { %v1026_v55 = vpop.eup %1025  ;;  %v576_v8 = vadd.f32 1e-12, %v574_v4 }
 0x6a9   :  { %v578_v12 = vmul.f32 %v1026_v55, %v575_v52  ;;  %vm584_vm10 = vweird.f32 %v1026_v55  ;;  %v675_v52 = vperm.slane %v1191_v50, 7 }
 0x6aa   :  { %1027 = vrsqrt.f32 %v576_v8  ;;  %vm585_vm12 = vmor %vm583_vm11, %vm584_vm10  ;;  %vm593_vm14 = vweird.f32 %v576_v8 }
 0x6ab   :  { %v579_v56 = vmul.f32 %v1026_v55, %v578_v12 }
 0x6ad   :  { %v580_v57 = vmul.f32 0.5, %v579_v56 }
 0x6af   :  { %v581_v58 = vsub.f32 1.5, %v580_v57 }
 0x6b0   :  { %v1028_v59 = vpop.eup %1027 }
 0x6b1   :  { %v582_v62 = vmul.f32 %v1026_v55, %v581_v58  ;;  %v588_v63 = vmul.f32 %v1028_v59, %v576_v8  ;;  %vm594_vm13 = vweird.f32 %v1028_v59 }
 0x6b2   :  { %vm595_vm15 = vmor %vm593_vm14, %vm594_vm13 }
 0x6b3   :  { %v589_v0 = vmul.f32 %v1028_v59, %v588_v63  ;;  %v586_v2 = vsel %vm585_vm12, %v1026_v55, %v582_v62 }
 0x6b4   :  { %v597_v7 = vmul.f32 %v586_v2, %v563_v43 }
 0x6b5   :  { %v590_v3 = vmul.f32 0.5, %v589_v0 }
 0x6b6   :  { %v600_v5 = vmul.f32 %v599_v6, %v597_v7 }
 0x6b7   :  { %v591_v1 = vsub.f32 1.5, %v590_v3 }
 0x6b8   :  { %v603_v16 = vadd.f32 %v602_v13, %v600_v5 }
 0x6b9   :  { %v592_v9 = vmul.f32 %v1028_v59, %v591_v1 }
 0x6bb   :  { %v596_v11 = vsel %vm595_vm15, %v1028_v59, %v592_v9 }
 0x6bc   :  { %v598_v14 = vmul.f32 %v596_v11, %v564_v46 }
 0x6be   :  { %v601_v15 = vmul.f32 %v599_v6, %v598_v14 }
 0x6c0   :  { %v604_v17 = vadd.f32 %v602_v13, %v601_v15 }
 0x6c2   :  { %v605_v18 = vpack.c.bf16 %v604_v17, %v603_v16 }
 0x6c4   :  { %906 = vmatmul.msk.bf16.vlgmr.msrb.gmra.mxu2 %vm35_vm0, %v605_v18 }
 0x747   :  { %v635_v31 = vpop.f32.mrf.mxu2 }
 0x748   :  { %v636_v32 = vadd.f32 %v635_v31, %v610_v30 }
 0x74a   :  { %v642_v33 = vmul.f32 0.044715, %v636_v32  ;;  %v640_v46 = vmul.f32 0.5, %v636_v32 }
 0x74c   :  { %v644_v37 = vmul.f32 %v642_v33, %v636_v32 }
 0x74e   :  { %v646_v38 = vmul.f32 %v644_v37, %v636_v32 }
 0x74f   :  { %v637_v39 = vpop.f32.mrf.mxu2 }
 0x750   :  { %v648_v36 = vadd.f32 %v646_v38, %v636_v32  ;;  %v638_v40 = vadd.f32 %v637_v39, %v610_v30 }
 0x752   :  { %v643_v20 = vmul.f32 0.044715, %v638_v40  ;;  %v650_v22 = vmul.f32 0.7978846, %v648_v36  ;;  %v641_v47 = vmul.f32 0.5, %v638_v40 }
 0x754   :  { %v645_v41 = vmul.f32 %v643_v20, %v638_v40  ;;  %1029 = vtanh.f32 %v650_v22 }
 0x756   :  { %v647_v42 = vmul.f32 %v645_v41, %v638_v40 }
 0x758   :  { %v649_v43 = vadd.f32 %v647_v42, %v638_v40 }
 0x75a   :  { %v651_v45 = vmul.f32 0.7978846, %v649_v43  ;;  %v1030_v35 = vpop.eup %1029 }
 0x75b   :  { %v654_v60 = vadd.f32 1.0, %v1030_v35 }
 0x75c   :  { %1031 = vtanh.f32 %v651_v45 }
 0x75d   :  { %v656_v61 = vmul.f32 %v654_v60, %v640_v46 }
 0x762   :  { %v1032_v44 = vpop.eup %1031 }
 0x763   :  { %v655_v48 = vadd.f32 1.0, %v1032_v44 }
 0x765   :  { %v657_v49 = vmul.f32 %v655_v48, %v641_v47 }
 0x767   :  { %v658_v51 = vpack.c.bf16 %v657_v49, %v656_v61 }
 0x769   :  { %732 = vmatmul.bf16.vlgmr.msra.gmra.mxu3 %v658_v51 }
 0x7ec   :  { %v733_v53 = vpop.f32.mrf.mxu3 }
 0x7ed   :  { %v734_v54 = vadd.f32 %v733_v53, %v675_v52 }
 0x7ef   :  { %v738_v4 = vadd.f32 %v734_v54, %v603_v16 }
 0x7f1   :  { %v740_v55 = vsel %vm35_vm0, %v738_v4, 0.0 }
 0x7f2   :  { %741 = vadd.xlane.f32.xlu1 %v740_v55 }
 0x7f4   :  { %v735_v8 = vpop.f32.mrf.mxu3 }
 0x7f5   :  { %v736_v12 = vadd.f32 %v735_v8, %v675_v52 }
 0x7f7   :  { %v739_v56 = vadd.f32 %v736_v12, %v604_v17 }
 0x7f9   :  { %v743_v57 = vsel %vm35_vm0, %v739_v56, 0.0 }
 0x7fa   :  { %744 = vadd.xlane.f32.xlu0 %v743_v57 }
 0x865   :  { %v742_v58 = vpop.xlane.xlu1 %741 }
 0x866   :  { %v746_v59 = vmul.f32 %v742_v58, %v1150_v10 }
 0x868   :  { %v748_v62 = vsub.f32 %v738_v4, %v746_v59 }
 0x86a   :  { %v750_v63 = vmul.f32 %v748_v62, %v748_v62 }
 0x86c   :  { %v752_v0 = vsel %vm35_vm0, %v750_v63, 0.0 }
 0x86d   :  { %v745_v50 = vpop.xlane.xlu0 %744  ;;  %753 = vadd.xlane.f32.xlu0 %v752_v0 }
 0x86e   :  { %v747_v2 = vmul.f32 %v745_v50, %v1150_v10 }
 0x870   :  { %v749_v3 = vsub.f32 %v739_v56, %v747_v2 }
 0x872   :  { %v751_v1 = vmul.f32 %v749_v3, %v749_v3 }
 0x874   :  { %v755_v6 = vsel %vm35_vm0, %v751_v1, 0.0 }
 0x875   :  { %756 = vadd.xlane.f32.xlu2 %v755_v6 }
 0x881   :  { %796 = vrot.lane.b32.xlu0 %v1168_v26, %s1102_s28  ;;  %v28_v26 = vld [vmem:[%s1386_s1 + $0x8] sm:$0xff] }
 0x882   :  { %v784_v25 = vperm.slane %v28_v26, 0  ;;  %v787_v29 = vperm.slane %v28_v26, 1  ;;  %v793_v41 = vperm.slane %v28_v26, 2 }
 0x88d   :  { %794 = vrot.lane.b32.xlu2 %v1184_v34, %s1102_s28  ;;  %s1105_s28 = smov 8  }
 0x8e0   :  { %v754_v7 = vpop.xlane.xlu0 %753 }
 0x8e1   :  { %v758_v9 = vmul.f32 %v754_v7, %v1150_v10 }
 0x8e3   :  { %v760_v11 = vadd.f32 1e-12, %v758_v9 }
 0x8e5   :  { %1033 = vrsqrt.f32 %v760_v11  ;;  %vm768_vm2 = vweird.f32 %v760_v11 }
 0x8e8   :  { %v757_v13 = vpop.xlane.xlu2 %756 }
 0x8e9   :  { %v759_v5 = vmul.f32 %v757_v13, %v1150_v10 }
 0x8eb   :  { %v1034_v14 = vpop.eup %1033  ;;  %v761_v15 = vadd.f32 1e-12, %v759_v5 }
 0x8ec   :  { %v763_v16 = vmul.f32 %v1034_v14, %v760_v11  ;;  %vm769_vm1 = vweird.f32 %v1034_v14 }
 0x8ed   :  { %1035 = vrsqrt.f32 %v761_v15  ;;  %vm770_vm3 = vmor %vm768_vm2, %vm769_vm1  ;;  %vm778_vm5 = vweird.f32 %v761_v15 }
 0x8ee   :  { %v764_v17 = vmul.f32 %v1034_v14, %v763_v16 }
 0x8f0   :  { %v765_v18 = vmul.f32 0.5, %v764_v17  ;;  %v795_v10 = vpop.permute.xlu2 %794 }
 0x8f2   :  { %v766_v19 = vsub.f32 1.5, %v765_v18 }
 0x8f3   :  { %v1036_v34 = vpop.eup %1035  ;;  %v797_v21 = vpop.permute.xlu0 %796 }
 0x8f4   :  { %v767_v23 = vmul.f32 %v1034_v14, %v766_v19  ;;  %v773_v24 = vmul.f32 %v1036_v34, %v761_v15  ;;  %809 = vmatpush.bf16.msrb.mxu0 %v797_v21  ;;  %vm779_vm4 = vweird.f32 %v1036_v34 }
 0x8f5   :  { %vm780_vm6 = vmor %vm778_vm5, %vm779_vm4 }
 0x8f6   :  { %v771_v27 = vsel %vm770_vm3, %v1034_v14, %v767_v23  ;;  %v774_v28 = vmul.f32 %v1036_v34, %v773_v24 }
 0x8f7   :  { %v782_v30 = vmul.f32 %v771_v27, %v748_v62 }
 0x8f8   :  { %v775_v31 = vmul.f32 0.5, %v774_v28  ;;  %810 = vmatpush.bf16.msrb.mxu0 %v795_v10 }
 0x8f9   :  { %v785_v32 = vmul.f32 %v784_v25, %v782_v30 }
 0x8fa   :  { %v776_v33 = vsub.f32 1.5, %v775_v31 }
 0x8fb   :  { %v788_v37 = vadd.f32 %v787_v29, %v785_v32 }
 0x8fc   :  { %v777_v38 = vmul.f32 %v1036_v34, %v776_v33 }
 0x8fd   :  { %790 = vst.msk [vmem:[#allocation2] sm:$0xff] %vm35_vm0, %v788_v37 }
 0x8fe   :  { %v781_v39 = vsel %vm780_vm6, %v1036_v34, %v777_v38 }
 0x8ff   :  { %v783_v36 = vmul.f32 %v781_v39, %v749_v3 }
 0x901   :  { %v786_v40 = vmul.f32 %v784_v25, %v783_v36 }
 0x903   :  { %v789_v20 = vadd.f32 %v787_v29, %v786_v40 }
 0x905   :  { %791 = vst.msk [vmem:[#allocation2 + $0x8] sm:$0xff] %vm35_vm0, %v789_v20  ;;  %v792_v22 = vpack.c.bf16 %v789_v20, %v788_v37 }
 0x906   :  { %834 = dma.vmem_to_hbm [thread:$0]  %s827_s26, 256, %s829_s0, [#allocation3], %s1104_s27, %s1104_s27, %s1105_s28  }
 0x907   :  { %939 = vmatmul.msk.bf16.vlgmr.msrb.gmra.mxu0 %vm35_vm0, %v792_v22 }
 0x984   :  { %v812_v42 = vpop.f32.mrf.mxu0 }
 0x985   :  { %v813_v43 = vadd.f32 %v812_v42, %v793_v41 }
 0x987   :  { %1037 = vtanh.f32 %v813_v43 }
 0x98c   :  { %v814_v45 = vpop.f32.mrf.mxu0 }
 0x98d   :  { %v1038_v35 = vpop.eup %1037  ;;  %v815_v60 = vadd.f32 %v814_v45, %v793_v41 }
 0x98e   :  { %820 = vst.msk [vmem:[#allocation4] sm:$0x1] %vm819_vm7, %v1038_v35 }
 0x98f   :  { %1039 = vtanh.f32 %v815_v60 }
 0x995   :  { %v1040_v44 = vpop.eup %1039 }
 0x996   :  { %821 = vst.msk [vmem:[#allocation4 + $0x1] sm:$0x1] %vm819_vm7, %v1040_v44 }
 0x997   :  { %845 = dma.vmem_to_hbm [thread:$0]  %s841_s30, 32, %s843_s8, [#allocation5]  }
 0x998   :  { %1089 = dma.done.wait [#allocation3], 256  }
 0x999   :  { %1090 = vsyncadd [#allocation3], 4294967040 }
 0x99a   :  { %1091 = dma.done.wait [#allocation5], 32  }
 0x99b   :  { %1092 = vsyncadd [#allocation5], 4294967264 }
 0x99c   :  { %854 = vsyncpa [#allocation3], 1 }
 0x99d   :  { %855 = vsyncpa [#allocation5], 1 }

</bundles_post_ra>
